<compile_context>
chip_gen: v5e
topology: v5e:2x2
jax: 0.10.0
libtpu: 0.0.40
codegen_flags: <defaults>
</compile_context>

<pallas_src>
import functools

import jax
import jax.numpy as jnp
from jax.experimental import pallas as pl
from jax.experimental.pallas import tpu as pltpu


def _round_up(n, m):
    return ((n + m - 1) // m) * m


def final_layer_kernel(x_ref, w_ref, wsum_ref, b_ref, o_ref):
    # x_ref: (TILE, H); w_ref: (H, C); wsum_ref/b_ref: (1, C) f32; o_ref: (TILE, C)
    h = x_ref.shape[-1]
    x = x_ref[...]                                   # raw input dtype -> MXU
    xf = x.astype(jnp.float32)

    # Per-row LayerNorm statistics in f32 (biased variance, eps=1e-6, matches torch).
    inv_h = 1.0 / h
    mean = jnp.sum(xf, axis=-1, keepdims=True) * inv_h
    ex2 = jnp.sum(xf * xf, axis=-1, keepdims=True) * inv_h
    var = jnp.maximum(ex2 - mean * mean, 0.0)        # clamp: E[x^2]-E[x]^2 can cancel <0
    inv_std = jax.lax.rsqrt(var + 1e-6)

    # MXU on raw x (input dtype), f32 accumulation; LN folded into the epilogue.
    xw = jnp.dot(x, w_ref[...], preferred_element_type=jnp.float32)   # (TILE, C)
    y = (xw - mean * wsum_ref[...]) * inv_std + b_ref[...]
    o_ref[...] = y.astype(o_ref.dtype)


def _vmem_budget_bytes():
    # Generation-aware VMEM ceiling with headroom: ~96 MiB on v5e/v6e (128 MiB
    # physical), ~48 MiB on v7x (64 MiB physical). Conservative fallback if the
    # trace-time query is unavailable.
    try:
        cap = int(pltpu.get_tpu_info().vmem_capacity_bytes)
    except Exception:
        cap = 64 * 1024 * 1024
    return max(min(cap - 16 * 1024 * 1024, 96 * 1024 * 1024), 32 * 1024 * 1024)


@functools.partial(jax.jit, static_argnames=("tile_rows",))
def final_layer(x, weight, bias, *, tile_rows=2048):
    """FinalLayer forward.

    x: (B, T, H); weight: (C, H) (PyTorch nn.Linear layout); bias: (C,) -> (B, T, C).
    The conditioning input `c` of the PyTorch module is unused by its forward and is
    therefore not taken here.
    """
    B, T, H = x.shape
    C = weight.shape[0]
    rows = B * T
    in_item = jnp.dtype(x.dtype).itemsize
    sublane = max(8, 32 // max(in_item, 1))          # 8 (f32), 16 (bf16), 32 (int8/fp8)

    vmem_budget = _vmem_budget_bytes()

    # Conservative per-step VMEM estimate (double-buffered x tile + in-kernel f32
    # working set + lane-padded output) used to cap the row tile inside the budget.
    c_pad = _round_up(C, 128)
    resident = 2 * (H * c_pad * in_item + 2 * c_pad * 4)          # W, colsum(W), bias
    per_row = H * (2 * in_item + 3 * 4) + 2 * c_pad * max(in_item, 4)
    avail = max(vmem_budget - resident - 8 * 1024 * 1024, per_row * sublane)
    max_tile = max((avail // per_row) // sublane * sublane, sublane)

    tile = min(tile_rows, max_tile, _round_up(rows, sublane))
    tile = max((tile // sublane) * sublane, sublane)
    # Force >=2 grid steps when rows allow so the "parallel" axis can use both
    # TensorCores on v7x (near-free on single-TC v5e/v6e).
    if rows >= 2 * sublane and pl.cdiv(rows, tile) < 2:
        tile = _round_up(pl.cdiv(rows, 2), sublane)
    grid = pl.cdiv(rows, tile)

    x2d = x.reshape(rows, H)                          # no pad: ragged tail handled by Pallas
    w_t = weight.T.astype(x.dtype)                    # (H, C): MXU fed in the input dtype
    wsum = jnp.sum(weight.astype(jnp.float32), axis=1).reshape(1, C)   # colsum over H, f32
    b2d = bias.astype(jnp.float32).reshape(1, C)

    out2d = pl.pallas_call(
        final_layer_kernel,
        out_shape=jax.ShapeDtypeStruct((rows, C), x.dtype),
        grid_spec=pltpu.PrefetchScalarGridSpec(
            num_scalar_prefetch=0,
            grid=(grid,),
            in_specs=[
                pl.BlockSpec((tile, H), lambda i: (i, 0)),   # streamed row tiles
                pl.BlockSpec((H, C), lambda i: (0, 0)),      # weight: VMEM-resident
                pl.BlockSpec((1, C), lambda i: (0, 0)),      # colsum(W): resident
                pl.BlockSpec((1, C), lambda i: (0, 0)),      # bias: resident
            ],
            out_specs=pl.BlockSpec((tile, C), lambda i: (i, 0)),
        ),
        compiler_params=pltpu.CompilerParams(
            dimension_semantics=("parallel",),        # rows independent (megacore / v7x)
            vmem_limit_bytes=vmem_budget,
        ),
    )(x2d, w_t, wsum, b2d)

    return out2d.reshape(B, T, C)


def _reference(x, weight, bias):
    mean = jnp.mean(x, axis=-1, keepdims=True)
    var = jnp.mean((x - mean) ** 2, axis=-1, keepdims=True)
    x_norm = (x - mean) / jnp.sqrt(var + 1e-6)
    return x_norm @ weight.T + bias


if __name__ == "__main__":
    key = jax.random.PRNGKey(0)

    # ---- 1) Small, module-consistent shapes (f32) ----
    B, T, H, C = 2, 8, 32, 4
    kx, kc, kw, kb = jax.random.split(key, 4)
    x = jax.random.normal(kx, (B, T, H), dtype=jnp.float32)
    c = jax.random.normal(kc, (B, H), dtype=jnp.float32)  # unused by forward (matches spec module)
    bound = 1.0 / (H ** 0.5)
    weight = jax.random.uniform(kw, (C, H), jnp.float32, -bound, bound)
    bias = jax.random.uniform(kb, (C,), jnp.float32, -bound, bound)

    out = jax.block_until_ready(final_layer(x, weight, bias))
    ref = _reference(x, weight, bias)
    assert out.shape == (B, T, C)
    # Tolerance covers possible bf16 MXU input rounding on the raw-x matmul vs. the
    # reference's normalized-input matmul (identical in exact arithmetic).
    assert jnp.allclose(out, ref, atol=1e-2, rtol=1e-2), float(jnp.max(jnp.abs(out - ref)))

    # ---- 2) bf16 path: MXU fed in input dtype, f32 stats/accumulation ----
    x_bf = x.astype(jnp.bfloat16)
    w_bf = weight.astype(jnp.bfloat16)
    b_bf = bias.astype(jnp.bfloat16)
    out_bf = jax.block_until_ready(final_layer(x_bf, w_bf, b_bf))
    ref_bf = _reference(x_bf.astype(jnp.float32), w_bf.astype(jnp.float32),
                        b_bf.astype(jnp.float32))
    assert out_bf.dtype == jnp.bfloat16
    assert jnp.allclose(out_bf.astype(jnp.float32), ref_bf, atol=5e-2, rtol=5e-2)

    # ---- 3) Ragged rows + multi-step grid, no wrapper-side pad ----
    # rows = 1992 -> two tiles of 1000, second block ragged (992 valid rows).
    B2, T2, H2, C2 = 2, 996, 256, 32
    k2x, k2w, k2b = jax.random.split(jax.random.PRNGKey(1), 3)
    x2 = jax.random.normal(k2x, (B2, T2, H2), dtype=jnp.float32)
    bound2 = 1.0 / (H2 ** 0.5)
    weight2 = jax.random.uniform(k2w, (C2, H2), jnp.float32, -bound2, bound2)
    bias2 = jax.random.uniform(k2b, (C2,), jnp.float32, -bound2, bound2)
    out2 = jax.block_until_ready(final_layer(x2, weight2, bias2))
    ref2 = _reference(x2, weight2, bias2)
    assert out2.shape == (B2, T2, C2)
    assert jnp.allclose(out2, ref2, atol=2e-2, rtol=2e-2), float(jnp.max(jnp.abs(out2 - ref2)))

    print("KERNEL_OK")
</pallas_src>

<mosaic_0001>
module attributes {stable_mosaic.version = 11 : i64} {
  func.func @final_layer_kernel(%arg0: i32, %arg1: memref<8x32xf32, #tpu.memory_space<vmem>>, %arg2: memref<32x4xf32, #tpu.memory_space<vmem>>, %arg3: memref<1x4xf32, #tpu.memory_space<vmem>>, %arg4: memref<1x4xf32, #tpu.memory_space<vmem>>, %arg5: memref<8x4xf32, #tpu.memory_space<vmem>>) attributes {dimension_semantics = [#tpu.dimension_semantics<parallel>], iteration_bounds = array<i64: 2>, scalar_prefetch = 0 : i64, scratch_operands = 0 : i64, tpu.core_type = #tpu.core_type<tc>, window_params = [{transform_indices = @transform_0, window_bounds = array<i64: 8, 32>}, {pipeline_mode = #tpu.pipeline_mode<synchronous>, transform_indices = @transform_1, window_bounds = array<i64: 32, 4>}, {pipeline_mode = #tpu.pipeline_mode<synchronous>, transform_indices = @transform_2, window_bounds = array<i64: 1, 4>}, {pipeline_mode = #tpu.pipeline_mode<synchronous>, transform_indices = @transform_3, window_bounds = array<i64: 1, 4>}, {transform_indices = @transform_4, window_bounds = array<i64: 8, 4>}]} {
    %c0 = arith.constant 0 : index
    %c0_0 = arith.constant 0 : index
    %0 = vector.load %arg1[%c0, %c0_0] : memref<8x32xf32, #tpu.memory_space<vmem>>, vector<8x32xf32>
    %cst = arith.constant dense<0.000000e+00> : vector<8xf32>
    %1 = vector.multi_reduction <add>, %0, %cst [1] : vector<8x32xf32> to vector<8xf32>
    %2 = vector.shape_cast %1 : vector<8xf32> to vector<8x1xf32>
    %cst_1 = arith.constant 3.125000e-02 : f32
    %3 = vector.broadcast %cst_1 : f32 to vector<8x1xf32>
    %4 = arith.mulf %2, %3 : vector<8x1xf32>
    %5 = arith.mulf %0, %0 : vector<8x32xf32>
    %cst_2 = arith.constant dense<0.000000e+00> : vector<8xf32>
    %6 = vector.multi_reduction <add>, %5, %cst_2 [1] : vector<8x32xf32> to vector<8xf32>
    %7 = vector.shape_cast %6 : vector<8xf32> to vector<8x1xf32>
    %cst_3 = arith.constant 3.125000e-02 : f32
    %8 = vector.broadcast %cst_3 : f32 to vector<8x1xf32>
    %9 = arith.mulf %7, %8 : vector<8x1xf32>
    %10 = arith.mulf %4, %4 : vector<8x1xf32>
    %11 = arith.subf %9, %10 : vector<8x1xf32>
    %cst_4 = arith.constant 0.000000e+00 : f32
    %12 = vector.broadcast %cst_4 : f32 to vector<8x1xf32>
    %13 = arith.maximumf %11, %12 : vector<8x1xf32>
    %cst_5 = arith.constant 9.99999997E-7 : f32
    %14 = vector.broadcast %cst_5 : f32 to vector<8x1xf32>
    %15 = arith.addf %13, %14 : vector<8x1xf32>
    %16 = math.rsqrt %15 : vector<8x1xf32>
    %c0_6 = arith.constant 0 : index
    %c0_7 = arith.constant 0 : index
    %17 = vector.load %arg2[%c0_6, %c0_7] : memref<32x4xf32, #tpu.memory_space<vmem>>, vector<32x4xf32>
    %cst_8 = arith.constant dense<0.000000e+00> : vector<8x4xf32>
    %18 = tpu.matmul %0, %17, %cst_8 {dimension_numbers = #tpu.dot_dimension_numbers<[1], [0], [0], [1], [0, 0, 1, 1], [], []>} : vector<8x32xf32>, vector<32x4xf32>, vector<8x4xf32> -> vector<8x4xf32>
    %c0_9 = arith.constant 0 : index
    %c0_10 = arith.constant 0 : index
    %19 = vector.load %arg3[%c0_9, %c0_10] : memref<1x4xf32, #tpu.memory_space<vmem>>, vector<1x4xf32>
    %20 = vector.broadcast %4 : vector<8x1xf32> to vector<8x4xf32>
    %21 = vector.broadcast %19 : vector<1x4xf32> to vector<8x4xf32>
    %22 = arith.mulf %20, %21 : vector<8x4xf32>
    %23 = arith.subf %18, %22 : vector<8x4xf32>
    %24 = vector.broadcast %16 : vector<8x1xf32> to vector<8x4xf32>
    %25 = arith.mulf %23, %24 : vector<8x4xf32>
    %c0_11 = arith.constant 0 : index
    %c0_12 = arith.constant 0 : index
    %26 = vector.load %arg4[%c0_11, %c0_12] : memref<1x4xf32, #tpu.memory_space<vmem>>, vector<1x4xf32>
    %27 = vector.broadcast %26 : vector<1x4xf32> to vector<8x4xf32>
    %28 = arith.addf %25, %27 : vector<8x4xf32>
    %c0_13 = arith.constant 0 : index
    %c0_14 = arith.constant 0 : index
    %29 = vector.load %arg5[%c0_13, %c0_14] : memref<8x4xf32, #tpu.memory_space<vmem>>, vector<8x4xf32>
    tpu.vector_store %arg5[%c0_13, %c0_14], %28 {strides = array<i32>} : memref<8x4xf32, #tpu.memory_space<vmem>>, vector<8x4xf32>,
    return
  }
  func.func @transform_0(%arg0: i32) -> (i32, i32) {
    %c0_i32 = arith.constant 0 : i32
    %c0_i32_0 = arith.constant 0 : i32
    return %arg0, %c0_i32 : i32, i32
  }
  func.func @transform_1(%arg0: i32) -> (i32, i32) {
    %c0_i32 = arith.constant 0 : i32
    %c0_i32_0 = arith.constant 0 : i32
    %c0_i32_1 = arith.constant 0 : i32
    return %c0_i32, %c0_i32_0 : i32, i32
  }
  func.func @transform_2(%arg0: i32) -> (i32, i32) {
    %c0_i32 = arith.constant 0 : i32
    %c0_i32_0 = arith.constant 0 : i32
    %c0_i32_1 = arith.constant 0 : i32
    return %c0_i32, %c0_i32_0 : i32, i32
  }
  func.func @transform_3(%arg0: i32) -> (i32, i32) {
    %c0_i32 = arith.constant 0 : i32
    %c0_i32_0 = arith.constant 0 : i32
    %c0_i32_1 = arith.constant 0 : i32
    return %c0_i32, %c0_i32_0 : i32, i32
  }
  func.func @transform_4(%arg0: i32) -> (i32, i32) {
    %c0_i32 = arith.constant 0 : i32
    %c0_i32_0 = arith.constant 0 : i32
    return %arg0, %c0_i32 : i32, i32
  }
}

</mosaic_0001>

<bundles_post_ra>
// kernel: final_layer.1
= control target key start
LH: loop header
LB: loop body
LE: loop exit
PB: predicated region body
PF: predicated region fallthrough
CT: control target
= control target key end

     0   :  { %s367_s15 = smov 0   ;;  %s409_s0 = inlined_call_operand.vmem [shape: f32[16,32], index: 0, kind: input, shape index: {}]   ;;  %s410_s1 = inlined_call_operand.vmem [shape: f32[32,4], index: 1, kind: input, shape index: {}]   ;;  %s411_s2 = inlined_call_operand.vmem [shape: f32[1,4], index: 2, kind: input, shape index: {}]   ;;  %s412_s3 = inlined_call_operand.vmem [shape: f32[1,4], index: 3, kind: input, shape index: {}]   ;;  %s413_s4 = inlined_call_operand.vmem [shape: f32[16,4], index: 4, kind: output, shape index: {}]  }
   0x1 LB: > { %s312_s16 = sadd.s32 4294967295, %s340_s15   ;;  %p316_p0 = scmp.ge.s32.totalorder %s340_s15, 1  ;;  %s340_s15 = sphi %s367_s15, %s14_s15  }
   0x2   : > { %p161_p1 = scmp.lt.s32.totalorder %s340_s15, 3 }
   0x4   : > { %p162_p2 = pnand %p316_p0, %p161_p1 }
   0x5   : > { %p185_p3 = scmp.lt.s32.totalorder (!%p162_p2), %s312_s16, 1 }
   0x6   : > { %165 = sbr.rel (%p162_p2) target bundleno = 171 (0xab), region = 36 }
   0xb   : > { %v221_v0 = vld [vmem:[%s410_s1 + $0x18] sm:$0xff]  ;;  %v220_v1 = vld [vmem:[%s410_s1 + $0x10] sm:$0xff]  ;;  %v219_v2 = vld [vmem:[%s410_s1 + $0x8] sm:$0xff]  ;;  %s415_s16 = smov (!%p185_p3, %s312_s16), 1  ;;  %vm194_vm0 = vcmask 261120   ;;  %vm257_vm4 = vcmask 31744  }
   0xc   : > { %237 = vmatpush.msra.mxu0 %v221_v0  ;;  %v218_v3 = vld [vmem:[%s410_s1] sm:$0xff]  ;;  %s317_s25 = sshll.u32 %s415_s16, 3 }
   0xd   : > { %s188_s28 = scalar_lea.vmem %s409_s0, %s317_s25  ;;  %v330_v19 = vld [vmem:[%s411_s2] ss:$0 sm:$0xff]  ;;  %s192_s9 = scalar_lea.vmem %s413_s4, %s317_s25 }
   0xe   : > { %238 = vmatpush.msra.mxu0 %v220_v1  ;;  %v193_v4 = vld [vmem:[%s188_s28] sm:$0xff] }
   0xf   : > { %v195_v5 = vsel %vm194_vm0, %v193_v4, 0.0  ;;  %v199_v6 = vmul.f32 %v193_v4, %v193_v4  ;;  %v331_v26 = vld [vmem:[%s412_s3] ss:$0 sm:$0xff] }
  0x10   : > { %239 = vmatpush.msra.mxu0 %v219_v2  ;;  %196 = vadd.xlane.f32.xlu0 %v195_v5 }
  0x11   : > { %v200_v7 = vsel %vm194_vm0, %v199_v6, 0.0 }
  0x12   : > { %240 = vmatpush.msra.mxu0 %v218_v3 }
  0x13   : > { %319 = vmatmul.msk.f32.vlgmr.msra.gmra.mxu0 %vm194_vm0, %v193_v4 }
  0x18   : > { %201 = vadd.xlane.f32.xlu0 %v200_v7 }
  0x83   : > { %v197_v8 = vpop.xlane.xlu0 %196 }
  0x84   : > { %v198_v9 = vmul.f32 0.03125, %v197_v8 }
  0x86   : > { %v204_v11 = vmul.f32 %v198_v9, %v198_v9  ;;  %v249_v23 = vmul.f32 %v330_v19, %v198_v9 }
  0x8b   : > { %v202_v10 = vpop.xlane.xlu0 %201 }
  0x8c   : > { %v203_v12 = vmul.f32 0.03125, %v202_v10 }
  0x8e   : > { %v205_v13 = vsub.f32 %v203_v12, %v204_v11 }
  0x90   : > { %v206_v14 = vmax.f32 %v205_v13, 0.0  ;;  %v242_v22 = vpop.f32.mrf.mxu0 }
  0x91   : > { %v250_v25 = vsub.f32 %v242_v22, %v249_v23 }
  0x92   : > { %v207_v15 = vadd.f32 1e-06, %v206_v14 }
  0x94   : > { %332 = vrsqrt.f32 %v207_v15  ;;  %vm214_vm2 = vweird.f32 %v207_v15 }
  0x9a   : > { %v333_v16 = vpop.eup %332 }
  0x9b   : > { %v209_v17 = vmul.f32 %v333_v16, %v207_v15  ;;  %vm215_vm1 = vweird.f32 %v333_v16 }
  0x9c   : > { %vm216_vm3 = vmor %vm214_vm2, %vm215_vm1 }
  0x9d   : > { %v210_v18 = vmul.f32 %v333_v16, %v209_v17 }
  0x9f   : > { %v211_v20 = vmul.f32 0.5, %v210_v18 }
  0xa1   : > { %v212_v21 = vsub.f32 1.5, %v211_v20 }
  0xa3   : > { %v213_v24 = vmul.f32 %v333_v16, %v212_v21 }
  0xa5   : > { %v217_v27 = vsel %vm216_vm3, %v333_v16, %v213_v24 }
  0xa6   : > { %v251_v28 = vmul.f32 %v250_v25, %v217_v27 }
  0xa8   : > { %v256_v29 = vadd.f32 %v331_v26, %v251_v28 }
  0xaa   : > { %258 = vst.msk [vmem:[%s192_s9] sm:$0xff] %vm257_vm4, %v256_v29 }
  0xab PF: > { %s14_s15 = sadd.s32 1, %s340_s15  }
  0xac   : > { %p11_p4 = scmp.ge.s32.totalorder %s14_s15, 4  }
  0xae   :  { %13 = sbr.rel (!%p11_p4) target bundleno = 1 (0x1), region = 66 }

</bundles_post_ra>
